<compile_context>
chip_gen: v6e
topology: v6e:2x2x1
jax: 0.10.0
libtpu: 0.0.40
codegen_flags: <defaults>
</compile_context>

<pallas_src>
import functools

import jax
import jax.numpy as jnp
from jax.experimental import pallas as pl
from jax.experimental.pallas import tpu as pltpu

LANE = 128


def _round_up(x, m):
    return (x + m - 1) // m * m


# ---------------------------------------------------------------------------
# Kernels
# ---------------------------------------------------------------------------
def _mlp_compute(x_ref, w1_ref, b1_ref, w2_ref, b2_ref):
    # x arrives as f32 straight from HBM; cast to bf16 in-kernel (VPU, hidden
    # under the MXU) instead of paying a wrapper-side pad/cast HBM pass.
    x = x_ref[...].astype(jnp.bfloat16)
    # layer_1 with BatchNorm(eval) pre-folded into (w1, b1):
    #   h = relu(x @ w1' + b1')     -- bf16 operands, f32 accumulate
    h = jnp.dot(x, w1_ref[...], preferred_element_type=jnp.float32)
    h = jnp.maximum(h + b1_ref[...], 0.0)  # f32 elementwise (v5e-safe)
    # Dropout(p=0.1) is identity in eval mode.
    # layer_out: y = h @ w2 (+ b2 only when output_dim > 1)
    y = jnp.dot(h.astype(jnp.bfloat16), w2_ref[...],
                preferred_element_type=jnp.float32)
    if b2_ref is not None:
        y = y + b2_ref[...]
    return y


def mlp_kernel_bias(x_ref, w1_ref, b1_ref, w2_ref, b2_ref, o_ref):
    o_ref[...] = _mlp_compute(x_ref, w1_ref, b1_ref, w2_ref, b2_ref).astype(o_ref.dtype)


def mlp_kernel_nobias(x_ref, w1_ref, b1_ref, w2_ref, o_ref):
    o_ref[...] = _mlp_compute(x_ref, w1_ref, b1_ref, w2_ref, None).astype(o_ref.dtype)


# ---------------------------------------------------------------------------
# VMEM planning
# ---------------------------------------------------------------------------
def _vmem_budget_and_limit():
    """Per-generation (v5e/v6e: 128 MiB, v7x: 64 MiB) planning budget + limit."""
    try:
        cap = int(pltpu.get_tpu_info().vmem_capacity_bytes)
    except Exception:
        cap = 64 * 1024 * 1024  # conservative (v7x-sized) fallback
    budget = cap // 2                               # planning budget for buffers
    limit = min(cap - (8 << 20), (cap * 3) // 4)    # explicit scoped-VMEM limit
    return budget, limit


def _pick_batch_tile(batch, d_in, h_p, d_out_p, budget):
    """Largest batch tile whose real footprint stays inside the VMEM budget."""
    # Resident weights/biases are single-buffered (pl.Buffered(1)) -> count once.
    weights = d_in * h_p * 2 + h_p * 4 + h_p * d_out_p * 2 + d_out_p * 4

    def footprint(tb):
        # double-buffered pipelined x (f32) and output (bf16) tiles
        acts = 2 * tb * d_in * 4 + 2 * tb * d_out_p * 2
        # in-body temporaries: x(bf16), h(f32) + h(bf16) copy, y(f32)
        tmps = tb * (d_in * 2 + h_p * 6 + d_out_p * 4)
        return weights + acts + tmps

    tb = 2048
    while tb > 16 and footprint(tb) > budget:
        tb //= 2

    if batch <= tb:
        if batch > 256:
            # Split big batches into (at least) two grid steps so the
            # "parallel" batch axis can be sharded across v7x's 2 TensorCores.
            tb = _round_up((batch + 1) // 2, 8)
        else:
            # One block covering the whole batch (block dim == full array dim,
            # so no (8,128) divisibility constraint and no batch padding).
            tb = batch
    return tb


def _resident_spec(shape):
    """Grid-invariant operand: constant index_map + single buffer."""
    try:
        return pl.BlockSpec(shape, lambda i: (0, 0), pipeline_mode=pl.Buffered(1))
    except TypeError:  # very old JAX without pipeline_mode: fall back to default
        return pl.BlockSpec(shape, lambda i: (0, 0))


# ---------------------------------------------------------------------------
# Wrapper
# ---------------------------------------------------------------------------
@functools.partial(jax.jit, static_argnames=("output_dim",))
def mlp_forward(x, params, output_dim):
    """x: [B, input_dim] f32. params: dict with w1[D_in,H], b1[1,H], BN stats,
    w2[H, out_cols] and (iff output_dim > 1) b2[1, out_cols]."""
    B, D_in = x.shape
    H = params["w1"].shape[1]
    has_bias = output_dim > 1
    out_cols = output_dim if has_bias else 1

    # --- Fold BatchNorm1d (eval) into layer_1's weight and bias. -----------
    eps = 1e-5
    scale = params["gamma"] * jax.lax.rsqrt(params["var"] + eps)       # [1, H]
    w1 = params["w1"] * scale                                          # [D_in, H]
    b1 = (params["b1"] - params["mean"]) * scale + params["beta"]      # [1, H]
    w2 = params["w2"]                                                  # [H, out_cols]

    # --- Pad only the (small) weights to lane-dense shapes. -----------------
    H_p = _round_up(H, LANE)
    D_out_p = _round_up(out_cols, LANE)

    budget, vmem_limit = _vmem_budget_and_limit()
    TB = _pick_batch_tile(B, D_in, H_p, D_out_p, budget)
    grid = (pl.cdiv(B, TB),)

    w1_p = jnp.pad(w1, ((0, 0), (0, H_p - H))).astype(jnp.bfloat16)
    b1_p = jnp.pad(b1, ((0, 0), (0, H_p - H))).astype(jnp.float32)
    w2_p = jnp.pad(w2, ((0, H_p - H), (0, D_out_p - out_cols))).astype(jnp.bfloat16)

    ops = [x, w1_p, b1_p, w2_p]
    in_specs = [
        pl.BlockSpec((TB, D_in), lambda i: (i, 0)),   # x: batch-tiled, f32, un-padded
        _resident_spec((D_in, H_p)),                  # weights: VMEM-resident, 1 buffer
        _resident_spec((1, H_p)),
        _resident_spec((H_p, D_out_p)),
    ]
    if has_bias:
        b2_p = jnp.pad(params["b2"],
                       ((0, 0), (0, D_out_p - out_cols))).astype(jnp.float32)
        ops.append(b2_p)
        in_specs.append(_resident_spec((1, D_out_p)))
        kernel = mlp_kernel_bias
    else:
        kernel = mlp_kernel_nobias

    bytes_accessed = (B * D_in * 4 + D_in * H_p * 2 + H_p * 4 +
                      H_p * D_out_p * 2 + (D_out_p * 4 if has_bias else 0) +
                      B * D_out_p * 2)
    cost = pl.CostEstimate(
        flops=2 * B * (D_in * H_p + H_p * D_out_p),
        transcendentals=0,
        bytes_accessed=bytes_accessed,
    )

    out_p = pl.pallas_call(
        kernel,
        out_shape=jax.ShapeDtypeStruct((B, D_out_p), jnp.bfloat16),
        grid=grid,
        in_specs=in_specs,
        out_specs=pl.BlockSpec((TB, D_out_p), lambda i: (i, 0)),
        compiler_params=pltpu.CompilerParams(
            dimension_semantics=("parallel",),
            vmem_limit_bytes=int(vmem_limit)),
        cost_estimate=cost,
    )(*ops)

    # Slice away lane padding; return f32 to match the PyTorch module's dtype.
    return out_p[:, :out_cols].astype(jnp.float32)


# ---------------------------------------------------------------------------
# Parameter init + pure-JAX reference (eval-mode torch semantics)
# ---------------------------------------------------------------------------
def init_params(key, input_dim, hidden_dim, output_dim):
    hidden_dim = max(hidden_dim, 2)
    k1, k2, k3, k4 = jax.random.split(key, 4)

    bound1 = 1.0 / jnp.sqrt(input_dim)
    w1 = jax.random.uniform(k1, (input_dim, hidden_dim), jnp.float32, -bound1, bound1)
    b1 = jax.random.uniform(k2, (1, hidden_dim), jnp.float32, -bound1, bound1)

    bound2 = 1.0 / jnp.sqrt(hidden_dim)
    out_cols = output_dim if output_dim > 1 else 1
    w2 = jax.random.uniform(k3, (hidden_dim, out_cols), jnp.float32, -bound2, bound2)

    params = dict(
        w1=w1, b1=b1, w2=w2,
        # BatchNorm1d defaults: weight=1, bias=0, running_mean=0, running_var=1
        gamma=jnp.ones((1, hidden_dim), jnp.float32),
        beta=jnp.zeros((1, hidden_dim), jnp.float32),
        mean=jnp.zeros((1, hidden_dim), jnp.float32),
        var=jnp.ones((1, hidden_dim), jnp.float32),
    )
    if output_dim > 1:
        params["b2"] = jax.random.uniform(k4, (1, out_cols), jnp.float32, -bound2, bound2)
    return params


def reference_forward(x, params, output_dim):
    eps = 1e-5
    h = x @ params["w1"] + params["b1"]
    h = (h - params["mean"]) * jax.lax.rsqrt(params["var"] + eps) \
        * params["gamma"] + params["beta"]
    h = jnp.maximum(h, 0.0)
    y = h @ params["w2"]
    if output_dim > 1:
        y = y + params["b2"]
    return y


if __name__ == "__main__":
    key = jax.random.PRNGKey(0)
    kx, kp = jax.random.split(key)

    batch, input_dim, hidden_dim, output_dim = 8, 16, 32, 4
    x = jax.random.normal(kx, (batch, input_dim), jnp.float32)

    # Classification head (output_dim > 1, biased layer_out).
    params = init_params(kp, input_dim, hidden_dim, output_dim)
    out = jax.block_until_ready(mlp_forward(x, params, output_dim))
    ref = reference_forward(x, params, output_dim)
    assert out.shape == (batch, output_dim)
    assert jnp.allclose(out, ref, atol=5e-2, rtol=5e-2), "mismatch vs reference (cls)"

    # Regression head (output_dim == 1, bias-free layer_out).
    params1 = init_params(kp, input_dim, hidden_dim, 1)
    out1 = jax.block_until_ready(mlp_forward(x, params1, 1))
    ref1 = reference_forward(x, params1, 1)
    assert out1.shape == (batch, 1)
    assert jnp.allclose(out1, ref1, atol=5e-2, rtol=5e-2), "mismatch vs reference (reg)"

    print("KERNEL_OK")
</pallas_src>

<mosaic_0001>
module attributes {stable_mosaic.version = 11 : i64} {
  func.func @mlp_kernel_bias(%arg0: i32, %arg1: memref<8x16xf32, #tpu.memory_space<vmem>>, %arg2: memref<16x128xbf16, #tpu.memory_space<vmem>>, %arg3: memref<1x128xf32, #tpu.memory_space<vmem>>, %arg4: memref<128x128xbf16, #tpu.memory_space<vmem>>, %arg5: memref<1x128xf32, #tpu.memory_space<vmem>>, %arg6: memref<8x128xbf16, #tpu.memory_space<vmem>>) attributes {dimension_semantics = [#tpu.dimension_semantics<parallel>], iteration_bounds = array<i64: 1>, scalar_prefetch = 0 : i64, scratch_operands = 0 : i64, tpu.core_type = #tpu.core_type<tc>, window_params = [{transform_indices = @transform_0, window_bounds = array<i64: 8, 16>}, {pipeline_mode = #tpu.pipeline_mode<synchronous>, transform_indices = @transform_1, window_bounds = array<i64: 16, 128>}, {pipeline_mode = #tpu.pipeline_mode<synchronous>, transform_indices = @transform_2, window_bounds = array<i64: 1, 128>}, {pipeline_mode = #tpu.pipeline_mode<synchronous>, transform_indices = @transform_3, window_bounds = array<i64: 128, 128>}, {pipeline_mode = #tpu.pipeline_mode<synchronous>, transform_indices = @transform_4, window_bounds = array<i64: 1, 128>}, {transform_indices = @transform_5, window_bounds = array<i64: 8, 128>}]} {
    %c0 = arith.constant 0 : index
    %c0_0 = arith.constant 0 : index
    %0 = vector.load %arg1[%c0, %c0_0] : memref<8x16xf32, #tpu.memory_space<vmem>>, vector<8x16xf32>
    %1 = arith.truncf %0 : vector<8x16xf32> to vector<8x16xbf16>
    %c0_1 = arith.constant 0 : index
    %c0_2 = arith.constant 0 : index
    %2 = vector.load %arg2[%c0_1, %c0_2] : memref<16x128xbf16, #tpu.memory_space<vmem>>, vector<16x128xbf16>
    %cst = arith.constant dense<0.000000e+00> : vector<8x128xf32>
    %3 = tpu.matmul %1, %2, %cst {dimension_numbers = #tpu.dot_dimension_numbers<[1], [0], [0], [1], [0, 0, 1, 1], [], []>} : vector<8x16xbf16>, vector<16x128xbf16>, vector<8x128xf32> -> vector<8x128xf32>
    %c0_3 = arith.constant 0 : index
    %c0_4 = arith.constant 0 : index
    %4 = vector.load %arg3[%c0_3, %c0_4] : memref<1x128xf32, #tpu.memory_space<vmem>>, vector<1x128xf32>
    %5 = vector.broadcast %4 : vector<1x128xf32> to vector<8x128xf32>
    %6 = arith.addf %3, %5 : vector<8x128xf32>
    %cst_5 = arith.constant 0.000000e+00 : f32
    %7 = vector.broadcast %cst_5 : f32 to vector<8x128xf32>
    %8 = arith.maximumf %6, %7 : vector<8x128xf32>
    %9 = arith.truncf %8 : vector<8x128xf32> to vector<8x128xbf16>
    %c0_6 = arith.constant 0 : index
    %c0_7 = arith.constant 0 : index
    %10 = vector.load %arg4[%c0_6, %c0_7] : memref<128x128xbf16, #tpu.memory_space<vmem>>, vector<128x128xbf16>
    %cst_8 = arith.constant dense<0.000000e+00> : vector<8x128xf32>
    %11 = tpu.matmul %9, %10, %cst_8 {dimension_numbers = #tpu.dot_dimension_numbers<[1], [0], [0], [1], [0, 0, 1, 1], [], []>} : vector<8x128xbf16>, vector<128x128xbf16>, vector<8x128xf32> -> vector<8x128xf32>
    %c0_9 = arith.constant 0 : index
    %c0_10 = arith.constant 0 : index
    %12 = vector.load %arg5[%c0_9, %c0_10] : memref<1x128xf32, #tpu.memory_space<vmem>>, vector<1x128xf32>
    %13 = vector.broadcast %12 : vector<1x128xf32> to vector<8x128xf32>
    %14 = arith.addf %11, %13 : vector<8x128xf32>
    %15 = arith.truncf %14 : vector<8x128xf32> to vector<8x128xbf16>
    %c0_11 = arith.constant 0 : index
    %c0_12 = arith.constant 0 : index
    %16 = vector.load %arg6[%c0_11, %c0_12] : memref<8x128xbf16, #tpu.memory_space<vmem>>, vector<8x128xbf16>
    tpu.vector_store %arg6[%c0_11, %c0_12], %15 {strides = array<i32>} : memref<8x128xbf16, #tpu.memory_space<vmem>>, vector<8x128xbf16>,
    return
  }
  func.func @transform_0(%arg0: i32) -> (i32, i32) {
    %c0_i32 = arith.constant 0 : i32
    %c0_i32_0 = arith.constant 0 : i32
    return %arg0, %c0_i32 : i32, i32
  }
  func.func @transform_1(%arg0: i32) -> (i32, i32) {
    %c0_i32 = arith.constant 0 : i32
    %c0_i32_0 = arith.constant 0 : i32
    %c0_i32_1 = arith.constant 0 : i32
    return %c0_i32, %c0_i32_0 : i32, i32
  }
  func.func @transform_2(%arg0: i32) -> (i32, i32) {
    %c0_i32 = arith.constant 0 : i32
    %c0_i32_0 = arith.constant 0 : i32
    %c0_i32_1 = arith.constant 0 : i32
    return %c0_i32, %c0_i32_0 : i32, i32
  }
  func.func @transform_3(%arg0: i32) -> (i32, i32) {
    %c0_i32 = arith.constant 0 : i32
    %c0_i32_0 = arith.constant 0 : i32
    %c0_i32_1 = arith.constant 0 : i32
    return %c0_i32, %c0_i32_0 : i32, i32
  }
  func.func @transform_4(%arg0: i32) -> (i32, i32) {
    %c0_i32 = arith.constant 0 : i32
    %c0_i32_0 = arith.constant 0 : i32
    %c0_i32_1 = arith.constant 0 : i32
    return %c0_i32, %c0_i32_0 : i32, i32
  }
  func.func @transform_5(%arg0: i32) -> (i32, i32) {
    %c0_i32 = arith.constant 0 : i32
    %c0_i32_0 = arith.constant 0 : i32
    return %arg0, %c0_i32 : i32, i32
  }
}

</mosaic_0001>

<bundles_post_ra>
// kernel: mlp_forward.1
= control target key start
LH: loop header
LB: loop body
LE: loop exit
PB: predicated region body
PF: predicated region fallthrough
CT: control target
= control target key end

     0   :  { %v261_v0 = vmov 0.0   ;;  %vm262_vm0 = vmmov 0   ;;  %vm38_vm1 = vcmask 130048   ;;  %s332_s1 = inlined_call_operand.vmem [shape: bf16[16,128], index: 1, kind: input, shape index: {}]   ;;  %s333_s0 = inlined_call_operand.vmem [shape: f32[8,16], index: 0, kind: input, shape index: {}]   ;;  %s334_s3 = inlined_call_operand.vmem [shape: bf16[128,128], index: 3, kind: input, shape index: {}]   ;;  %s335_s2 = inlined_call_operand.vmem [shape: f32[1,128], index: 2, kind: input, shape index: {}]   ;;  %s336_s4 = inlined_call_operand.vmem [shape: f32[1,128], index: 4, kind: input, shape index: {}]   ;;  %s337_s5 = inlined_call_operand.vmem [shape: bf16[8,128], index: 5, kind: output, shape index: {}]  }
   0x1   :  { %224 = vmatprep.subr.bf16.mxu0 %v261_v0  ;;  %v252_v1 = vld [vmem:[%s332_s1] sm:$0xff]   ;;  %226 = vmatprep.mubr.msk.bf16.mxu0 %vm262_vm0, %v261_v0  ;;  %v253_v4 = vld [vmem:[%s334_s3 + $0x38] sm:$0xff]   ;;  %v254_v5 = vld [vmem:[%s334_s3 + $0x30] sm:$0xff]  }
   0x2   :  { %v21_v2 = vld [vmem:[%s333_s0] sm:$0xff]  ;;  %230 = vmatprep.subr.bf16.mxu1 %v261_v0  ;;  %246 = vmatprep.mubr.msk.bf16.mxu1 %vm262_vm0, %v261_v0  ;;  %v255_v6 = vld [vmem:[%s334_s3 + $0x28] sm:$0xff]   ;;  %v257_v8 = vld [vmem:[%s334_s3 + $0x18] sm:$0xff]  }
   0x3   :  { %225 = vmatpush3.bf16.msra.mxu0 %v252_v1  ;;  %v22_v3 = vpack.c.bf16 %v21_v2, %v21_v2  ;;  %231 = vmatpush3.bf16.msra.mxu1 %v253_v4  ;;  %v256_v7 = vld [vmem:[%s334_s3 + $0x20] sm:$0xff]   ;;  %v258_v9 = vld [vmem:[%s334_s3 + $0x10] sm:$0xff]   ;;  %v259_v10 = vld [vmem:[%s334_s3 + $0x8] sm:$0xff]  }
   0x4   :  { %232 = vmatprep.subr.bf16.mxu1 %v261_v0  ;;  %v260_v11 = vld [vmem:[%s334_s3] sm:$0xff]  }
   0x5   :  { %v201_v12 = vld [vmem:[%s335_s2] ss:$0 sm:$0xff] }
   0x6   :  { %227 = vmatmul.mubr.msk.bf16.vlgmr.msra.gmra.mxu0 %vm38_vm1, %v22_v3  ;;  %v204_v20 = vld [vmem:[%s336_s4] ss:$0 sm:$0xff] }
   0x7   :  { %233 = vmatpush3.bf16.msra.mxu1 %v254_v5 }
   0x8   :  { %234 = vmatprep.subr.bf16.mxu1 %v261_v0 }
   0xb   :  { %235 = vmatpush3.bf16.msra.mxu1 %v255_v6 }
   0xc   :  { %236 = vmatprep.subr.bf16.mxu1 %v261_v0 }
   0xf   :  { %237 = vmatpush3.bf16.msra.mxu1 %v256_v7 }
  0x10   :  { %238 = vmatprep.subr.bf16.mxu1 %v261_v0 }
  0x13   :  { %239 = vmatpush3.bf16.msra.mxu1 %v257_v8 }
  0x14   :  { %240 = vmatprep.subr.bf16.mxu1 %v261_v0 }
  0x17   :  { %241 = vmatpush3.bf16.msra.mxu1 %v258_v9 }
  0x18   :  { %242 = vmatprep.subr.bf16.mxu1 %v261_v0 }
  0x1b   :  { %243 = vmatpush3.bf16.msra.mxu1 %v259_v10 }
  0x1c   :  { %244 = vmatprep.subr.bf16.mxu1 %v261_v0 }
  0x1f   :  { %245 = vmatpush3.bf16.msra.mxu1 %v260_v11 }
  0xc6   :  { %v76_v13 = vpop.f32.mrf.mxu0 }
  0xc7   :  { %v77_v14 = vadd.f32 %v201_v12, %v76_v13 }
  0xc8   :  { %v228_v15 = vpop.f32.mrf.mxu0 }
  0xc9   :  { %v82_v16 = vmax.f32 %v77_v14, 0.0 }
  0xca   :  { %v79_v17 = vpop.f32.mrf.mxu0 }
  0xcb   :  { %v83_v18 = vpack.c.bf16 %v82_v16, %v82_v16 }
  0xcc   :  { %v229_v19 = vpop.f32.mrf.mxu0 }
  0xcd   :  { %247 = vmatmul.mubr.bf16.vlgmr.msra.gmra.mxu1 %v83_v18 }
 0x18d   :  { %v189_v21 = vpop.f32.mrf.mxu1 }
 0x18e   :  { %v190_v22 = vadd.f32 %v204_v20, %v189_v21 }
 0x18f   :  { %v248_v23 = vpop.f32.mrf.mxu1 }
 0x190   :  { %v195_v24 = vpack.c.bf16 %v190_v22, %v190_v22 }
 0x191   :  { %v192_v25 = vpop.f32.mrf.mxu1 }
 0x192   :  { %196 = vst [vmem:[%s337_s5] sm:$0xf] %v195_v24 }
 0x193   :  { %v249_v26 = vpop.f32.mrf.mxu1 }

</bundles_post_ra>
